<compile_context>
chip_gen: v6e
topology: v6e:2x2x1
jax: 0.10.0
libtpu: 0.0.40
codegen_flags: <defaults>
</compile_context>

<pallas_src>
import math
from functools import partial

import jax
import jax.numpy as jnp
from jax.experimental import pallas as pl
from jax.experimental.pallas import tpu as pltpu

_MiB = 1024 * 1024


def _round_up(x, m):
    return (x + m - 1) // m * m


def _cdiv(a, b):
    return (a + b - 1) // b


def _sublane_pack(dtype):
    """Rows per vreg sublane group: 8 for 32-bit, 16 for bf16, 32 for int8/fp8."""
    return max(8, 32 // max(1, jnp.dtype(dtype).itemsize))


def _physical_vmem_bytes():
    try:
        info = pltpu.get_tpu_info()
        cap = getattr(info, "vmem_capacity_bytes", None)
        if cap:
            return int(cap)
    except Exception:
        pass
    return 64 * _MiB  # conservative fallback: v7x per-TensorCore VMEM


def _vmem_bytes(tm, tf, d_model, itemsize, use_scratch):
    """Rough footprint: double-buffered I/O tiles + live f32 h (+ f32 acc)."""
    in_elems = tm * d_model + d_model * tf + tf + tf * d_model + d_model
    out_elems = tm * d_model
    total = 2 * (in_elems + out_elems) * itemsize + tm * tf * 4
    if use_scratch:
        total += tm * d_model * 4
    return total


# ----------------------------- kernel bodies ---------------------------------

def _ffn_step(x_ref, w1_ref, b1_ref, w2_ref, compute_dtype):
    """One (row-tile, d_ff-chunk) partial: relu(x@w1_k + b1_k) @ w2_k, f32."""
    x, w1, w2 = x_ref[...], w1_ref[...], w2_ref[...]
    if compute_dtype is not None:            # opt-in lower-precision MXU compute
        x = x.astype(compute_dtype)
        w1 = w1.astype(compute_dtype)
        w2 = w2.astype(compute_dtype)
    h = jnp.dot(x, w1, preferred_element_type=jnp.float32)
    h = jnp.maximum(h + b1_ref[...].astype(jnp.float32), 0.0)
    return jnp.dot(h.astype(w2.dtype), w2, preferred_element_type=jnp.float32)


def ffn_kernel_f32(x_ref, w1_ref, b1_ref, w2_ref, b2_ref, o_ref, *, compute_dtype):
    """f32 output: accumulate directly into the resident output block."""
    k = pl.program_id(1)

    @pl.when(k == 0)
    def _():
        o_ref[...] = jnp.zeros_like(o_ref)

    o_ref[...] += _ffn_step(x_ref, w1_ref, b1_ref, w2_ref, compute_dtype)

    @pl.when(k == pl.num_programs(1) - 1)
    def _():
        o_ref[...] += b2_ref[...].astype(o_ref.dtype)   # b2 added exactly once


def ffn_kernel_scratch(x_ref, w1_ref, b1_ref, w2_ref, b2_ref, o_ref, acc_ref,
                       *, compute_dtype):
    """Sub-f32 output: f32 VMEM accumulator, single cast/store in the epilogue."""
    k = pl.program_id(1)

    @pl.when(k == 0)
    def _():
        acc_ref[...] = jnp.zeros_like(acc_ref)

    acc_ref[...] += _ffn_step(x_ref, w1_ref, b1_ref, w2_ref, compute_dtype)

    @pl.when(k == pl.num_programs(1) - 1)
    def _():
        o_ref[...] = (acc_ref[...] + b2_ref[...].astype(jnp.float32)).astype(o_ref.dtype)


# ------------------------------ tile selection --------------------------------

def _pick_tf(d_ff, tm, d_model, itemsize, budget, use_scratch):
    if d_ff <= 128 or _vmem_bytes(tm, d_ff, d_model, itemsize, use_scratch) <= budget:
        return d_ff
    # Prefer divisors of d_ff that are 128-multiples (no weight padding), largest
    # that fits the VMEM budget.
    n = 1
    while d_ff // n >= 128:
        if d_ff % n == 0:
            cand = d_ff // n
            if cand % 128 == 0 and _vmem_bytes(tm, cand, d_model, itemsize,
                                               use_scratch) <= budget:
                return cand
        n += 1
    # Fallback (d_ff not 128-friendly): power-of-two chunk, padding handled below.
    tf = 128
    while tf * 2 <= d_ff and _vmem_bytes(tm, tf * 2, d_model, itemsize,
                                         use_scratch) <= budget:
        tf *= 2
    return tf


# --------------------------------- wrapper ------------------------------------

def feed_forward(x, w1, b1, w2, b2, *, tm=None, tf=None, compute_dtype=None,
                 vmem_budget_bytes=None):
    """x: [B, S, d_model] -> [B, S, d_model]. w1: [d_model, d_ff], w2: [d_ff, d_model]."""
    B, S, d_model = x.shape
    d_ff = w1.shape[1]
    M = B * S
    itemsize = jnp.dtype(x.dtype).itemsize
    out_dtype = x.dtype
    use_scratch = jnp.dtype(out_dtype) != jnp.dtype(jnp.float32)
    pack = _sublane_pack(x.dtype)

    # Generation-aware VMEM sizing (v5e/v6e: 128 MiB, v7x: 64 MiB per TC).
    phys_vmem = _physical_vmem_bytes()
    vmem_cap = min(phys_vmem * 3 // 4, 100 * _MiB)            # hard ceiling we request
    if vmem_budget_bytes is None:
        vmem_budget_bytes = min(int(phys_vmem * 0.45), 96 * _MiB)

    # ---- row tile: balanced, pack-aligned, >=2 tiles when possible (megacore) --
    if tm is None:
        tm_cap = 1024 if M > 512 else 512
        n_row = max(1, _cdiv(M, tm_cap))
        if n_row == 1 and M > pack:
            n_row = 2
        tm = _round_up(_cdiv(M, n_row), pack)
    tm = max(pack, _round_up(tm, pack))

    # ---- d_ff tile: largest divisor chunk that fits the VMEM budget ------------
    if tf is None:
        tf = _pick_tf(d_ff, tm, d_model, itemsize, vmem_budget_bytes, use_scratch)
    # If the plan still busts the budget (huge d_model), shrink tm.
    while tm > pack and _vmem_bytes(tm, tf, d_model, itemsize,
                                    use_scratch) > vmem_budget_bytes:
        tm = max(pack, _round_up(tm // 2, pack))

    M_pad = _round_up(M, tm)
    F_pad = _round_up(d_ff, tf)

    # ---- only the activation rows normally need padding ------------------------
    x2d = x.reshape(M, d_model)
    if M_pad != M:
        x2d = jnp.pad(x2d, ((0, M_pad - M), (0, 0)))
    w1p, b1p, w2p = w1, b1, w2
    if F_pad != d_ff:   # rare fallback path: tf does not divide d_ff
        w1p = jnp.pad(w1, ((0, 0), (0, F_pad - d_ff)))
        b1p = jnp.pad(b1, ((0, F_pad - d_ff),))
        w2p = jnp.pad(w2, ((0, F_pad - d_ff), (0, 0)))
    b1_2d = b1p.reshape(1, F_pad)
    b2_2d = b2.reshape(1, d_model)

    grid = (M_pad // tm, F_pad // tf)
    footprint = _vmem_bytes(tm, tf, d_model, itemsize, use_scratch)
    vmem_limit = int(min(vmem_cap, max(32 * _MiB, 2 * footprint)))

    kernel = partial(ffn_kernel_scratch if use_scratch else ffn_kernel_f32,
                     compute_dtype=compute_dtype)
    scratch = [pltpu.VMEM((tm, d_model), jnp.float32)] if use_scratch else []

    out2d = pl.pallas_call(
        kernel,
        out_shape=jax.ShapeDtypeStruct((M_pad, d_model), out_dtype),
        grid_spec=pltpu.PrefetchScalarGridSpec(
            num_scalar_prefetch=0,
            grid=grid,
            in_specs=[
                pl.BlockSpec((tm, d_model), lambda i, k: (i, 0)),   # x row tile
                pl.BlockSpec((d_model, tf), lambda i, k: (0, k)),   # w1 d_ff-chunk
                pl.BlockSpec((1, tf), lambda i, k: (0, k)),         # b1 chunk
                pl.BlockSpec((tf, d_model), lambda i, k: (k, 0)),   # w2 d_ff-chunk
                pl.BlockSpec((1, d_model), lambda i, k: (0, 0)),    # b2
            ],
            out_specs=pl.BlockSpec((tm, d_model), lambda i, k: (i, 0)),
            scratch_shapes=scratch,
        ),
        compiler_params=pltpu.CompilerParams(
            dimension_semantics=("parallel", "arbitrary"),
            vmem_limit_bytes=vmem_limit),
    )(x2d, w1p, b1_2d, w2p, b2_2d)

    return out2d[:M].reshape(B, S, d_model)


def init_params(key, d_model, d_ff, dtype=jnp.float32):
    """Deterministic init mimicking nn.Linear (uniform +/- 1/sqrt(fan_in))."""
    k1, k2, k3, k4 = jax.random.split(key, 4)
    bound1 = 1.0 / math.sqrt(d_model)
    bound2 = 1.0 / math.sqrt(d_ff)
    # Stored transposed vs. PyTorch: w1 is [d_model, d_ff], w2 is [d_ff, d_model]
    w1 = jax.random.uniform(k1, (d_model, d_ff), dtype, -bound1, bound1)
    b1 = jax.random.uniform(k2, (d_ff,), dtype, -bound1, bound1)
    w2 = jax.random.uniform(k3, (d_ff, d_model), dtype, -bound2, bound2)
    b2 = jax.random.uniform(k4, (d_model,), dtype, -bound2, bound2)
    return w1, b1, w2, b2


if __name__ == "__main__":
    # Small deterministic example consistent with FeedForward(d_model=32, d_ff=64).
    B, S, d_model, d_ff = 2, 8, 32, 64
    key = jax.random.PRNGKey(0)
    kx, kp = jax.random.split(key)
    x = jax.random.normal(kx, (B, S, d_model), jnp.float32)
    w1, b1, w2, b2 = init_params(kp, d_model, d_ff)

    out = jax.block_until_ready(feed_forward(x, w1, b1, w2, b2))
    ref = jnp.maximum(x @ w1 + b1, 0.0) @ w2 + b2
    assert out.shape == (B, S, d_model)
    assert jnp.allclose(out, ref, atol=1e-5, rtol=1e-5)

    # Also exercise the multi-step reduction + padded-row path (non-multiple shapes).
    B2, S2, dm2, df2 = 3, 7, 128, 384
    x2 = jax.random.normal(kx, (B2, S2, dm2), jnp.float32)
    p2 = init_params(kp, dm2, df2)
    out2 = jax.block_until_ready(feed_forward(x2, *p2, tf=128))
    ref2 = jnp.maximum(x2 @ p2[0] + p2[1], 0.0) @ p2[2] + p2[3]
    assert jnp.allclose(out2, ref2, atol=1e-4, rtol=1e-4)

    print("KERNEL_OK")
</pallas_src>

<mosaic_0001>
module attributes {stable_mosaic.version = 11 : i64} {
  func.func @ffn_kernel_f32(%arg0: i32, %arg1: i32, %arg2: memref<8x32xf32, #tpu.memory_space<vmem>>, %arg3: memref<32x64xf32, #tpu.memory_space<vmem>>, %arg4: memref<1x64xf32, #tpu.memory_space<vmem>>, %arg5: memref<64x32xf32, #tpu.memory_space<vmem>>, %arg6: memref<1x32xf32, #tpu.memory_space<vmem>>, %arg7: memref<8x32xf32, #tpu.memory_space<vmem>>) attributes {dimension_semantics = [#tpu.dimension_semantics<parallel>, #tpu.dimension_semantics<arbitrary>], iteration_bounds = array<i64: 2, 1>, scalar_prefetch = 0 : i64, scratch_operands = 0 : i64, tpu.core_type = #tpu.core_type<tc>, window_params = [{transform_indices = @transform_0, window_bounds = array<i64: 8, 32>}, {transform_indices = @transform_1, window_bounds = array<i64: 32, 64>}, {transform_indices = @transform_2, window_bounds = array<i64: 1, 64>}, {transform_indices = @transform_3, window_bounds = array<i64: 64, 32>}, {pipeline_mode = #tpu.pipeline_mode<synchronous>, transform_indices = @transform_4, window_bounds = array<i64: 1, 32>}, {transform_indices = @transform_5, window_bounds = array<i64: 8, 32>}]} {
    %c0_i32 = arith.constant 0 : i32
    %0 = arith.cmpi eq, %arg1, %c0_i32 : i32
    %1 = arith.extui %0 : i1 to i32
    %c0_i32_0 = arith.constant 0 : i32
    %2 = arith.cmpi ne, %1, %c0_i32_0 : i32
    scf.if %2 {
      %cst_16 = arith.constant 0.000000e+00 : f32
      %19 = vector.broadcast %cst_16 : f32 to vector<8x32xf32>
      %c0_17 = arith.constant 0 : index
      %c0_18 = arith.constant 0 : index
      %20 = vector.load %arg7[%c0_17, %c0_18] : memref<8x32xf32, #tpu.memory_space<vmem>>, vector<8x32xf32>
      tpu.vector_store %arg7[%c0_17, %c0_18], %19 {strides = array<i32>} : memref<8x32xf32, #tpu.memory_space<vmem>>, vector<8x32xf32>,
    } else {
    }
    %c0 = arith.constant 0 : index
    %c0_1 = arith.constant 0 : index
    %3 = vector.load %arg7[%c0, %c0_1] : memref<8x32xf32, #tpu.memory_space<vmem>>, vector<8x32xf32>
    %c0_2 = arith.constant 0 : index
    %c0_3 = arith.constant 0 : index
    %4 = vector.load %arg2[%c0_2, %c0_3] : memref<8x32xf32, #tpu.memory_space<vmem>>, vector<8x32xf32>
    %c0_4 = arith.constant 0 : index
    %c0_5 = arith.constant 0 : index
    %5 = vector.load %arg3[%c0_4, %c0_5] : memref<32x64xf32, #tpu.memory_space<vmem>>, vector<32x64xf32>
    %c0_6 = arith.constant 0 : index
    %c0_7 = arith.constant 0 : index
    %6 = vector.load %arg5[%c0_6, %c0_7] : memref<64x32xf32, #tpu.memory_space<vmem>>, vector<64x32xf32>
    %cst = arith.constant dense<0.000000e+00> : vector<8x64xf32>
    %7 = tpu.matmul %4, %5, %cst {dimension_numbers = #tpu.dot_dimension_numbers<[1], [0], [0], [1], [0, 0, 1, 1], [], []>} : vector<8x32xf32>, vector<32x64xf32>, vector<8x64xf32> -> vector<8x64xf32>
    %c0_8 = arith.constant 0 : index
    %c0_9 = arith.constant 0 : index
    %8 = vector.load %arg4[%c0_8, %c0_9] : memref<1x64xf32, #tpu.memory_space<vmem>>, vector<1x64xf32>
    %9 = vector.broadcast %8 : vector<1x64xf32> to vector<8x64xf32>
    %10 = arith.addf %7, %9 : vector<8x64xf32>
    %cst_10 = arith.constant 0.000000e+00 : f32
    %11 = vector.broadcast %cst_10 : f32 to vector<8x64xf32>
    %12 = arith.maximumf %10, %11 : vector<8x64xf32>
    %cst_11 = arith.constant dense<0.000000e+00> : vector<8x32xf32>
    %13 = tpu.matmul %12, %6, %cst_11 {dimension_numbers = #tpu.dot_dimension_numbers<[1], [0], [0], [1], [0, 0, 1, 1], [], []>} : vector<8x64xf32>, vector<64x32xf32>, vector<8x32xf32> -> vector<8x32xf32>
    %14 = arith.addf %3, %13 : vector<8x32xf32>
    %c0_12 = arith.constant 0 : index
    %c0_13 = arith.constant 0 : index
    %15 = vector.load %arg7[%c0_12, %c0_13] : memref<8x32xf32, #tpu.memory_space<vmem>>, vector<8x32xf32>
    tpu.vector_store %arg7[%c0_12, %c0_13], %14 {strides = array<i32>} : memref<8x32xf32, #tpu.memory_space<vmem>>, vector<8x32xf32>,
    %c0_i32_14 = arith.constant 0 : i32
    %16 = arith.cmpi eq, %arg1, %c0_i32_14 : i32
    %17 = arith.extui %16 : i1 to i32
    %c0_i32_15 = arith.constant 0 : i32
    %18 = arith.cmpi ne, %17, %c0_i32_15 : i32
    scf.if %18 {
      %c0_16 = arith.constant 0 : index
      %c0_17 = arith.constant 0 : index
      %19 = vector.load %arg7[%c0_16, %c0_17] : memref<8x32xf32, #tpu.memory_space<vmem>>, vector<8x32xf32>
      %c0_18 = arith.constant 0 : index
      %c0_19 = arith.constant 0 : index
      %20 = vector.load %arg6[%c0_18, %c0_19] : memref<1x32xf32, #tpu.memory_space<vmem>>, vector<1x32xf32>
      %21 = vector.broadcast %20 : vector<1x32xf32> to vector<8x32xf32>
      %22 = arith.addf %19, %21 : vector<8x32xf32>
      %c0_20 = arith.constant 0 : index
      %c0_21 = arith.constant 0 : index
      %23 = vector.load %arg7[%c0_20, %c0_21] : memref<8x32xf32, #tpu.memory_space<vmem>>, vector<8x32xf32>
      tpu.vector_store %arg7[%c0_20, %c0_21], %22 {strides = array<i32>} : memref<8x32xf32, #tpu.memory_space<vmem>>, vector<8x32xf32>,
    } else {
    }
    return
  }
  func.func @transform_0(%arg0: i32, %arg1: i32) -> (i32, i32) {
    %c0_i32 = arith.constant 0 : i32
    %c0_i32_0 = arith.constant 0 : i32
    return %arg0, %c0_i32 : i32, i32
  }
  func.func @transform_1(%arg0: i32, %arg1: i32) -> (i32, i32) {
    %c0_i32 = arith.constant 0 : i32
    %c0_i32_0 = arith.constant 0 : i32
    return %c0_i32, %arg1 : i32, i32
  }
  func.func @transform_2(%arg0: i32, %arg1: i32) -> (i32, i32) {
    %c0_i32 = arith.constant 0 : i32
    %c0_i32_0 = arith.constant 0 : i32
    return %c0_i32, %arg1 : i32, i32
  }
  func.func @transform_3(%arg0: i32, %arg1: i32) -> (i32, i32) {
    %c0_i32 = arith.constant 0 : i32
    %c0_i32_0 = arith.constant 0 : i32
    return %arg1, %c0_i32 : i32, i32
  }
  func.func @transform_4(%arg0: i32, %arg1: i32) -> (i32, i32) {
    %c0_i32 = arith.constant 0 : i32
    %c0_i32_0 = arith.constant 0 : i32
    %c0_i32_1 = arith.constant 0 : i32
    return %c0_i32, %c0_i32_0 : i32, i32
  }
  func.func @transform_5(%arg0: i32, %arg1: i32) -> (i32, i32) {
    %c0_i32 = arith.constant 0 : i32
    %c0_i32_0 = arith.constant 0 : i32
    return %arg0, %c0_i32 : i32, i32
  }
}

</mosaic_0001>

<bundles_post_ra>
// kernel: tpu_custom_call.1
= control target key start
LH: loop header
LB: loop body
LE: loop exit
PB: predicated region body
PF: predicated region fallthrough
CT: control target
= control target key end

     0   :  { %10 = vsyncpa [#allocation3], 0  ;;  %s976_s0 = inlined_call_operand.vmem [shape: f32[16,32], index: 0, kind: input, shape index: {}]   ;;  %s977_s1 = inlined_call_operand.vmem [shape: f32[32,64], index: 1, kind: input, shape index: {}]   ;;  %s978_s2 = inlined_call_operand.vmem [shape: f32[1,64], index: 2, kind: input, shape index: {}]   ;;  %s979_s3 = inlined_call_operand.vmem [shape: f32[64,32], index: 3, kind: input, shape index: {}]   ;;  %s980_s4 = inlined_call_operand.vmem [shape: f32[1,32], index: 4, kind: input, shape index: {}]   ;;  %s981_s5 = inlined_call_operand.hbm [shape: f32[16,32], index: 5, kind: output, shape index: {}]  }
   0x1   :  { %12 = vsyncpa [#allocation3 + $0x1], 0  ;;  %s829_s18 = smov 0   ;;  %s831_s19 = smov 0  }
   0x2   :  { %s833_s20 = smov 0   ;;  %s835_s21 = smov 0  }
   0x3   :  { %s837_s22 = smov 0   ;;  %s839_s23 = smov 0  }
   0x4 LB: > { %s599_s24 = sadd.s32 4294967295, %s794_s23   ;;  %s600_s25 = sadd.s32 4294967294, %s794_s23   ;;  %s794_s23 = sphi %s839_s23, %s18_s23   ;;  %s790_s22 = sphi %s837_s22, %s988_s22   ;;  %s786_s21 = sphi %s835_s21, %s987_s21   ;;  %s782_s20 = sphi %s833_s20, %s986_s20   ;;  %s778_s19 = sphi %s831_s19, %s985_s19   ;;  %s774_s18 = sphi %s829_s18, %s984_s18  }
   0x5   : > { %s30_s26 = sadd.s32 1, %s790_s22  ;;  %s162_s27 = sadd.s32 1, %s782_s20 }
   0x6   : > { %p32_p0 = scmp.ge.s32.totalorder %s30_s26, 2  ;;  %p172_p1 = scmp.ne.s32.totalorder %s782_s20, %s778_s19 }
   0x7   : > { %p173_p2 = scmp.eq.s32.totalorder %s599_s24, 1  ;;  %p178_p3 = scmp.ne.s32.totalorder %s778_s19, %s774_s18 }
   0x8   : > { %s990_s26 = smov (%p32_p0, %s30_s26), 0  ;;  %p179_p5 = scmp.eq.s32.totalorder %s600_s25, 1 }
   0x9   : > { %p869_p4 = por %p173_p2, %p172_p1  ;;  %s159_s29 = ssub.s32 %s790_s22, %s990_s26 }
   0xa   : > { %p606_p6 = scmp.ge.s32.totalorder %s794_s23, 1  ;;  %p160_p7 = scmp.eq.s32.totalorder %s159_s29, 0 }
   0xb   : > { %p876_p8 = por %p179_p5, %p178_p3  ;;  %p229_p9 = scmp.lt.s32.totalorder %s794_s23, 3 }
   0xc   : > { %s882_s6 = scalar_select %p160_p7, %s782_s20, %s162_s27  }
   0xd   : > { %p230_p10 = pnand %p606_p6, %p229_p9 }
   0xe   : > { %p268_p11 = scmp.lt.s32.totalorder (!%p230_p10), %s786_s21, 1  ;;  %s265_s29 = sand.u32 (!%p230_p10), 1, %s778_s19  }
   0xf   : > { %233 = sbr.rel (%p230_p10) target bundleno = 444 (0x1bc), region = 40  ;;  %s607_s7 = sshll.u32 (!%p230_p10), %s265_s29, 3 }
  0x10   : > { %s267_s8 = scalar_lea.vmem (!%p230_p10), [#allocation2], %s607_s7  ;;  %s798_s27 = smov (!%p230_p10), [#allocation2]  }
  0x11   : > { %s490_s14 = sshll.u32 (!%p230_p10), %s267_s8, 4  ;;  %s722_s7 = sshll.u32 (!%p230_p10), %s798_s27, 4  ;;  %s491_s14 = int_to_ptr.vmem [resolvable:$true] %s490_s14  ;;  %s723_s7 = int_to_ptr.vmem [resolvable:$false] %s722_s7 }
  0x12   : > { %s718_s25 = scalar_lea.vmem (!%p230_p10), %s491_s14, 128  ;;  %p725_p1 = scmp.lt.s32.totalorder (!%p230_p10), %s491_s14, %s723_s7 }
  0x13   : > { %p719_p12 = scmp.ne.s32.totalorder (!%p230_p10), %s491_s14, %s718_s25 }
  0x14   : > { %v296_v0 = vld [vmem:[%s977_s1 + $0x18] sm:$0xff]  ;;  %v796_v1 = vmov 0.0   ;;  %v295_v2 = vld [vmem:[%s977_s1 + $0x10] sm:$0xff]  ;;  %vm797_vm0 = vmmov 0   ;;  %s269_s13 = scalar_select %p268_p11, %s786_s21, 1  ;;  %v294_v5 = vld [vmem:[%s977_s1 + $0x8] sm:$0xff] }
  0x15   : > { %631 = vmatprep.subr.mxu0 %v796_v1  ;;  %639 = vmatprep.mubr.msk.f32.mxu0 %vm797_vm0, %v796_v1  ;;  %v304_v3 = vld [vmem:[%s979_s3 + $0x38] sm:$0xff]  ;;  %v303_v4 = vld [vmem:[%s979_s3 + $0x30] sm:$0xff]  ;;  %v302_v6 = vld [vmem:[%s979_s3 + $0x28] sm:$0xff]  ;;  %vm289_vm1 = vcmask 261120   ;;  %vm387_vm2 = vcmask 523264   ;;  %p720_p13 = pnand %p719_p12, %p869_p4 }
  0x16   : > { %632 = vmatpush3.msra.mxu0 %v296_v0  ;;  %642 = vmatprep.subr.mxu1 %v796_v1  ;;  %s608_s24 = sshll.u32 %s269_s13, 3  ;;  %v293_v7 = vld [vmem:[%s977_s1] sm:$0xff]  ;;  %v300_v10 = vld [vmem:[%s979_s3 + $0x18] sm:$0xff]  ;;  %v299_v11 = vld [vmem:[%s979_s3 + $0x10] sm:$0xff]  ;;  %290 = vst.msk [vmem:[%s267_s8] sm:$0xff] %vm289_vm1, %v796_v1  ;;  %s614_s13 = sshll.u32 %s786_s21, 7 }
  0x17   : > { %633 = vmatprep.subr.mxu0 %v796_v1  ;;  %643 = vmatpush3.msra.mxu1 %v304_v3  ;;  %s271_s10 = scalar_lea.vmem %s976_s0, %s608_s24  ;;  %v301_v9 = vld [vmem:[%s979_s3 + $0x20] sm:$0xff]  ;;  %v298_v12 = vld [vmem:[%s979_s3 + $0x8] sm:$0xff]  ;;  %s488_s17 = scalar_lea.hbm %s981_s5, %s614_s13 }
  0x18   : > { %634 = vmatpush3.msra.mxu0 %v295_v2  ;;  %644 = vmatprep.subr.mxu1 %v796_v1  ;;  %v292_v8 = vld [vmem:[%s271_s10] sm:$0xff]  ;;  %s477_s24 = scalar_lea.sflag [#allocation3], %s265_s29  ;;  %p721_p0 = pneg %p720_p13 }
  0x19   : > { %635 = vmatprep.subr.mxu0 %v796_v1  ;;  %645 = vmatpush3.msra.mxu1 %v303_v4  ;;  %v297_v13 = vld [vmem:[%s979_s3] sm:$0xff]  ;;  %s724_s21 = scalar_lea.vmem %s723_s7, 256 }
  0x1a   : > { %636 = vmatpush3.msra.mxu0 %v294_v5  ;;  %646 = vmatprep.subr.mxu1 %v796_v1  ;;  %v609_v14 = vld [vmem:[%s978_s2] ss:$0 sm:$0xff]  ;;  %p726_p2 = scmp.lt.s32.totalorder %s724_s21, %s718_s25 }
  0x1b   : > { %637 = vmatprep.subr.mxu0 %v796_v1  ;;  %647 = vmatpush3.msra.mxu1 %v302_v6  ;;  %v612_v23 = vld [vmem:[%s980_s4] ss:$0 sm:$0xff] }
  0x1c   : > { %638 = vmatpush3.msra.mxu0 %v293_v7  ;;  %648 = vmatprep.subr.mxu1 %v796_v1  ;;  %p727_p3 = por %p726_p2, %p725_p1 }
  0x1d   : > { %640 = vmatmul.mubr.msk.f32.vlgmr.msra.gmra.mxu0 %vm289_vm1, %v292_v8  ;;  %649 = vmatpush3.msra.mxu1 %v301_v9  ;;  %v291_v19 = vld [vmem:[%s267_s8] sm:$0xff] }
  0x1e   : > { %650 = vmatprep.subr.mxu1 %v796_v1  ;;  %658 = vmatprep.mubr.msk.f32.mxu1 %vm797_vm0, %v796_v1  ;;  %p728_p5 = pnand %p727_p3, %p721_p0 }
  0x1f   : > { %651 = vmatpush3.msra.mxu1 %v300_v10 }
  0x20   : > { %652 = vmatprep.subr.mxu1 %v796_v1 }
  0x21   : > { %653 = vmatpush3.msra.mxu1 %v299_v11 }
  0x22   : > { %654 = vmatprep.subr.mxu1 %v796_v1 }
  0x23   : > { %655 = vmatpush3.msra.mxu1 %v298_v12 }
  0x24   : > { %656 = vmatprep.subr.mxu1 %v796_v1 }
  0x25   : > { %657 = vmatpush3.msra.mxu1 %v297_v13 }
  0xdd   : > { %v382_v15 = vpop.f32.mrf.mxu0 }
  0xde   : > { %v383_v16 = vadd.f32 %v609_v14, %v382_v15 }
  0xdf   : > { %v641_v17 = vpop.f32.mrf.mxu0 }
  0xe0   : > { %v386_v18 = vmax.f32 %v383_v16, 0.0 }
  0xe2   : > { %659 = vmatmul.mubr.msk.f32.vlgmr.msra.gmra.mxu1 %vm387_vm2, %v386_v18 }
 0x1a2   : > { %v457_v20 = vpop.f32.mrf.mxu1 }
 0x1a3   : > { %v461_v21 = vadd.f32 %v457_v20, %v291_v19 }
 0x1a4   : > { %v660_v22 = vpop.f32.mrf.mxu1 }
 0x1a5   : > { %462 = vst.msk [vmem:[%s267_s8] sm:$0xff] %vm289_vm1, %v461_v21 }
 0x1ac   : > { %v466_v24 = vld [vmem:[%s267_s8] sm:$0xff] }
 0x1ad   : > { %v474_v25 = vadd.f32 %v612_v23, %v466_v24 }
 0x1af   : > { %475 = vst.msk [vmem:[%s267_s8] sm:$0xff] %vm289_vm1, %v474_v25 }
 0x1b0   : > { %731 = shalt.err (!%p728_p5)
}
 0x1b1   : > { %s732_s9 = scalar_lea.hbm %s488_s17, 128  ;;  %s736_s10 = scalar_lea.hbm %s981_s5, 256 }
 0x1b2   : > { %p733_p6 = scmp.ne.s32.totalorder %s488_s17, %s732_s9  ;;  %p737_p10 = scmp.lt.s32.totalorder %s488_s17, %s981_s5 }
 0x1b3   : > { %p738_p11 = scmp.lt.s32.totalorder %s736_s10, %s732_s9 }
 0x1b4   : > { %p734_p7 = pnand %p733_p6, %p869_p4 }
 0x1b5   : > { %p739_p12 = por %p738_p11, %p737_p10 }
 0x1b6   : > { %p735_p9 = pneg %p734_p7 }
 0x1b8   : > { %p740_p13 = pnand %p739_p12, %p735_p9 }
 0x1ba   : > { %743 = shalt.err (!%p740_p13)
}
 0x1bb   : > { %661 = dma.vmem_to_hbm [thread:$0]  (%p869_p4), %s491_s14, 128, %s488_s17, %s477_s24  }
 0x1bc PF: > { %p667_p0 = scmp.ge.s32.totalorder %s794_s23, 2  ;;  %s502_s13 = sand.u32 1, %s774_s18  }
 0x1bd   : > { %s503_s15 = scalar_lea.sflag [#allocation3], %s502_s13 }
 0x1be   : > { %p664_p1 = pnand %p667_p0, %p876_p8 }
 0x1c0   : > { %p665_p2 = pneg %p664_p1 }
 0x1c2   : > { %769 = dma.done.wait (%p665_p2), %s503_s15, 128  }
 0x1c3   : > { %771 = vsyncadd (%p665_p2), %s503_s15, 4294967168  ;;  %s18_s23 = sadd.s32 1, %s794_s23   ;;  %s984_s18 = smov %s778_s19 }
 0x1c4   : > { %p15_p3 = scmp.ge.s32.totalorder %s18_s23, 4   ;;  %s985_s19 = smov %s782_s20 }
 0x1c5   : > { %s986_s20 = smov %s882_s6  ;;  %s987_s21 = smov %s790_s22 }
 0x1c6   : > { %s988_s22 = smov %s990_s26  ;;  %17 = sbr.rel (!%p15_p3) target bundleno = 4 (0x4), region = 92 }
 0x1cb   :  { %508 = vsyncpa [#allocation3], 1 }
 0x1cc   :  { %510 = vsyncpa [#allocation3 + $0x1], 1 }

</bundles_post_ra>
